<compile_context>
chip_gen: v7x
topology: tpu7x:2x2x1
jax: 0.10.0
libtpu: 0.0.40
codegen_flags: <defaults>
</compile_context>

<pallas_src>
import math
import functools

import jax
import jax.numpy as jnp
from jax.experimental import pallas as pl
from jax.experimental.pallas import tpu as pltpu

_BN_EPS = 1e-5
_ACT_DTYPE = jnp.bfloat16       # activation / weight dtype on the MXU datapath


def _round_up(x, m):
    return (x + m - 1) // m * m


# ----------------------------------------------------------------------------
# Pallas kernels
# ----------------------------------------------------------------------------

def _mm_bn_kernel(x_ref, w_ref, b_ref, o_ref, acc_ref, *, relu):
    """K-tiled matmul: acc += x@w ; epilogue  out = relu?(acc + shift)."""
    k = pl.program_id(1)

    @pl.when(k == 0)
    def _():
        acc_ref[...] = jnp.zeros_like(acc_ref)

    acc_ref[...] += jnp.dot(x_ref[...], w_ref[...],
                            preferred_element_type=jnp.float32)

    @pl.when(k == pl.num_programs(1) - 1)
    def _():
        out = acc_ref[...] + b_ref[...]
        if relu:
            out = jnp.maximum(out, 0.0)
        o_ref[...] = out.astype(o_ref.dtype)


def _mm_bn_res_kernel(x_ref, w_ref, b_ref, r_ref, o_ref, acc_ref, *, relu):
    """Same as above, with a fused residual add in the epilogue."""
    k = pl.program_id(1)

    @pl.when(k == 0)
    def _():
        acc_ref[...] = jnp.zeros_like(acc_ref)

    acc_ref[...] += jnp.dot(x_ref[...], w_ref[...],
                            preferred_element_type=jnp.float32)

    @pl.when(k == pl.num_programs(1) - 1)
    def _():
        out = acc_ref[...] + b_ref[...] + r_ref[...].astype(jnp.float32)
        if relu:
            out = jnp.maximum(out, 0.0)
        o_ref[...] = out.astype(o_ref.dtype)


def _maxpool_kernel(ee_ref, eo_ref, ee1_ref, oe_ref, oo_ref, oe1_ref, o_ref):
    """3x3 stride-2 max-pool from 6 parity planes of the padded input.

    even-row planes (ee/eo/ee1): (1, OH+1, OW, C) — taps at rows oh and oh+1
    odd-row  planes (oe/oo/oe1): (1, OH,   OW, C) — taps at row  oh
    All in-kernel slices are along leading dims only (cheap).
    """
    OH = o_ref.shape[1]
    m = jnp.maximum(oe_ref[...], oo_ref[...])
    m = jnp.maximum(m, oe1_ref[...])
    for r in (ee_ref, eo_ref, ee1_ref):
        v = r[...]
        m = jnp.maximum(m, v[:, :OH])
        m = jnp.maximum(m, v[:, 1:OH + 1])
    o_ref[...] = m


def _pos_kernel(o_ref, *, H, W, n_steps, temperature=10000.0):
    """DETR sine position embedding for an all-ones mask.

    o_ref: (H*W, 2*n_steps); channels [0:n_steps] are pos_y, [n_steps:] pos_x.
    """
    HW, D = o_ref.shape
    scale = 2.0 * math.pi
    eps = 1e-6

    flat = jax.lax.broadcasted_iota(jnp.float32, (HW, D), 0)          # h*W + w
    i = jnp.floor(flat / float(W))                                    # row index h
    j = flat - i * float(W)                                           # col index w
    y_embed = (i + 1.0) / (float(H) + eps) * scale
    x_embed = (j + 1.0) / (float(W) + eps) * scale

    k = jax.lax.broadcasted_iota(jnp.int32, (HW, D), 1)               # channel index
    is_x = k >= n_steps
    kk = jnp.where(is_x, k - n_steps, k).astype(jnp.float32)
    half = jnp.floor(kk / 2.0)
    dim_t = jnp.exp((2.0 * half / float(n_steps)) * math.log(temperature))
    val = jnp.where(is_x, x_embed, y_embed) / dim_t
    even = (kk - 2.0 * half) < 0.5
    o_ref[...] = jnp.where(even, jnp.sin(val), jnp.cos(val))


# ----------------------------------------------------------------------------
# Wrappers around pallas_call
# ----------------------------------------------------------------------------

def conv_bn(x_nhwc, w_oihw, bn_scale, bn_shift, *, stride, padding, relu,
            residual=None):
    """Conv2d (no bias) + BatchNorm (eval) [+ residual] [+ ReLU].

    bf16 im2col (plain-JAX glue) feeding a K-tiled, M-tiled Pallas MXU matmul
    with BN scale folded into the weights and a fused epilogue.
    """
    N, H, W, Cin = x_nhwc.shape
    Cout, _, KH, KW = w_oihw.shape
    OH = (H + 2 * padding - KH) // stride + 1
    OW = (W + 2 * padding - KW) // stride + 1
    M = N * OH * OW
    K = KH * KW * Cin

    # ---- im2col glue (plain JAX, bf16) -------------------------------------
    # TODO(synk): fuse the patch extraction into the matmul kernel (needs
    # element-offset / manual-DMA windows for the strided taps) to remove the
    # remaining KH*KW-x HBM amplification; bf16 already halves it.
    x_nhwc = x_nhwc.astype(_ACT_DTYPE)
    if padding > 0:
        xp = jnp.pad(x_nhwc,
                     ((0, 0), (padding, padding), (padding, padding), (0, 0)))
    else:
        xp = x_nhwc
    taps = []
    for kh in range(KH):
        for kw in range(KW):
            taps.append(
                xp[:, kh:kh + stride * OH:stride, kw:kw + stride * OW:stride, :])
    patches = jnp.concatenate(taps, axis=-1).reshape(M, K)

    # fold BN scale into the (constant) weights; keep shift as a bias
    wmat = jnp.transpose(w_oihw, (2, 3, 1, 0)).reshape(K, Cout)
    wmat = (wmat * bn_scale.reshape(1, Cout).astype(jnp.float32)).astype(_ACT_DTYPE)
    shift2d = bn_shift.reshape(1, Cout).astype(jnp.float32)

    # ---- tiling -------------------------------------------------------------
    if M >= 256:
        tm = 256
    elif M >= 128:
        tm = 128
    else:
        tm = _round_up(M, 8)
    Mpad = _round_up(M, tm)

    if K <= 640:
        Kpad, tk = K, K                       # single K step
    else:
        Kpad = _round_up(K, 128)
        tk = next(t for t in (512, 384, 256, 128) if Kpad % t == 0)

    patches = jnp.pad(patches, ((0, Mpad - M), (0, Kpad - K)))
    if Kpad > K:
        wmat = jnp.pad(wmat, ((0, Kpad - K), (0, 0)))

    n_m, n_k = Mpad // tm, Kpad // tk

    in_specs = [
        pl.BlockSpec((tm, tk), lambda i, k: (i, k)),
        pl.BlockSpec((tk, Cout), lambda i, k: (k, 0)),
        pl.BlockSpec((1, Cout), lambda i, k: (0, 0)),
    ]
    args = [patches, wmat, shift2d]
    bytes_accessed = (Mpad * Kpad + Kpad * Cout + 2 * Mpad * Cout) * 2 + 4 * Cout

    if residual is not None:
        r = residual.astype(_ACT_DTYPE).reshape(M, Cout)
        r = jnp.pad(r, ((0, Mpad - M), (0, 0)))
        in_specs.append(pl.BlockSpec((tm, Cout), lambda i, k: (i, 0)))
        args.append(r)
        bytes_accessed += Mpad * Cout * 2
        kernel = functools.partial(_mm_bn_res_kernel, relu=relu)
    else:
        kernel = functools.partial(_mm_bn_kernel, relu=relu)

    out = pl.pallas_call(
        kernel,
        out_shape=jax.ShapeDtypeStruct((Mpad, Cout), _ACT_DTYPE),
        grid=(n_m, n_k),
        in_specs=in_specs,
        out_specs=pl.BlockSpec((tm, Cout), lambda i, k: (i, 0)),
        scratch_shapes=[pltpu.VMEM((tm, Cout), jnp.float32)],
        compiler_params=pltpu.CompilerParams(
            dimension_semantics=("parallel", "arbitrary"),
            vmem_limit_bytes=32 * 1024 * 1024),
        cost_estimate=pl.CostEstimate(
            flops=2 * Mpad * Kpad * Cout,
            transcendentals=0,
            bytes_accessed=int(bytes_accessed)),
    )(*args)
    return out[:M].reshape(N, OH, OW, Cout)


def maxpool_3x3_s2_p1(x):
    """MaxPool2d(kernel_size=3, stride=2, padding=1) via parity-plane reduction."""
    N, H, W, C = x.shape
    x = x.astype(_ACT_DTYPE)
    OH = (H - 1) // 2 + 1
    OW = (W - 1) // 2 + 1
    Hp2, Wp2 = 2 * (OH + 1), 2 * (OW + 1)
    xp = jnp.pad(x, ((0, 0), (1, Hp2 - 1 - H), (1, Wp2 - 1 - W), (0, 0)),
                 constant_values=-jnp.inf)

    # 6 parity planes (~1.5x the activation instead of the old 9x stacked copy).
    # TODO(synk): lane-densify the C=64 store path (flatten to a 128-multiple).
    ee = xp[:, 0:2 * OH + 2:2, 0:2 * OW:2, :]        # rows 2oh/2oh+2, cols 2ow
    eo = xp[:, 0:2 * OH + 2:2, 1:2 * OW + 1:2, :]    # rows 2oh/2oh+2, cols 2ow+1
    ee1 = xp[:, 0:2 * OH + 2:2, 2:2 * OW + 2:2, :]   # rows 2oh/2oh+2, cols 2ow+2
    oe = xp[:, 1:2 * OH + 1:2, 0:2 * OW:2, :]        # rows 2oh+1,     cols 2ow
    oo = xp[:, 1:2 * OH + 1:2, 1:2 * OW + 1:2, :]    # rows 2oh+1,     cols 2ow+1
    oe1 = xp[:, 1:2 * OH + 1:2, 2:2 * OW + 2:2, :]   # rows 2oh+1,     cols 2ow+2

    spec_e = pl.BlockSpec((1, OH + 1, OW, C), lambda n: (n, 0, 0, 0))
    spec_o = pl.BlockSpec((1, OH, OW, C), lambda n: (n, 0, 0, 0))

    return pl.pallas_call(
        _maxpool_kernel,
        out_shape=jax.ShapeDtypeStruct((N, OH, OW, C), _ACT_DTYPE),
        grid=(N,),
        in_specs=[spec_e, spec_e, spec_e, spec_o, spec_o, spec_o],
        out_specs=pl.BlockSpec((1, OH, OW, C), lambda n: (n, 0, 0, 0)),
        compiler_params=pltpu.CompilerParams(
            dimension_semantics=("parallel",)),
    )(ee, eo, ee1, oe, oo, oe1)


@functools.lru_cache(maxsize=8)
def _pos_table(H, W, pos_dim):
    """Input-independent DETR sine table (H*W, pos_dim); computed once, cached."""
    n_steps = pos_dim // 2
    D = 2 * n_steps
    HW = H * W
    kernel = functools.partial(_pos_kernel, H=H, W=W, n_steps=n_steps)
    return pl.pallas_call(
        kernel,
        out_shape=jax.ShapeDtypeStruct((HW, D), jnp.float32),
        grid=(1,),
        in_specs=[],
        out_specs=pl.BlockSpec((HW, D), lambda i: (0, 0)),
    )()


def sine_position_embedding(N, H, W, pos_dim):
    tab = _pos_table(H, W, pos_dim)
    return jnp.broadcast_to(tab[None], (N, H * W, tab.shape[-1]))


# ----------------------------------------------------------------------------
# ResNet18 parameter init (deterministic, matching __init__ shapes & init scheme)
# ----------------------------------------------------------------------------

def _kaiming(key, shape):
    # kaiming_normal_(mode='fan_out', nonlinearity='relu') for (Cout, Cin, KH, KW)
    fan_out = shape[0] * shape[2] * shape[3]
    std = math.sqrt(2.0 / fan_out)
    return jax.random.normal(key, shape, dtype=jnp.float32) * std


def _bn(c):
    # eval-mode BN with gamma=1, beta=0, running_mean=0, running_var=1
    scale = jnp.full((c,), 1.0 / math.sqrt(1.0 + _BN_EPS), dtype=jnp.float32)
    shift = jnp.zeros((c,), dtype=jnp.float32)
    return scale, shift


def init_resnet18_params(key):
    keys = iter(jax.random.split(key, 64))
    p = {"conv1": _kaiming(next(keys), (64, 3, 7, 7))}

    def make_layer(inplanes, planes, blocks, stride):
        layer = []
        for b in range(blocks):
            s = stride if b == 0 else 1
            in_c = inplanes if b == 0 else planes
            blk = {
                "conv1": _kaiming(next(keys), (planes, in_c, 3, 3)),
                "conv2": _kaiming(next(keys), (planes, planes, 3, 3)),
                "stride": s,
            }
            if s != 1 or in_c != planes:
                blk["down"] = _kaiming(next(keys), (planes, in_c, 1, 1))
            layer.append(blk)
        return layer

    p["layer1"] = make_layer(64, 64, 2, 1)
    p["layer2"] = make_layer(64, 128, 2, 2)
    p["layer3"] = make_layer(128, 256, 2, 2)
    p["layer4"] = make_layer(256, 512, 2, 2)
    return p


# ----------------------------------------------------------------------------
# Forward pass
# ----------------------------------------------------------------------------

def basic_block(x, blk):
    planes = blk["conv1"].shape[0]
    s, z = _bn(planes)
    stride = blk["stride"]
    out = conv_bn(x, blk["conv1"], s, z, stride=stride, padding=1, relu=True)
    if "down" in blk:
        residual = conv_bn(x, blk["down"], s, z, stride=stride, padding=0,
                           relu=False)
    else:
        residual = x
    out = conv_bn(out, blk["conv2"], s, z, stride=1, padding=1, relu=True,
                  residual=residual)
    return out


def image_encoder_forward(face_nchw, params, pos_dim):
    # NCHW -> NHWC, bf16 activation datapath
    x = jnp.transpose(face_nchw, (0, 2, 3, 1)).astype(_ACT_DTYPE)

    s64, z64 = _bn(64)
    x = conv_bn(x, params["conv1"], s64, z64, stride=2, padding=3, relu=True)
    # TODO(synk): space-to-depth reformulation of the 7x7/s2 stem so the MXU
    # contraction is not K=147.
    x = maxpool_3x3_s2_p1(x)

    for layer in ("layer1", "layer2", "layer3", "layer4"):
        for blk in params[layer]:
            x = basic_block(x, blk)

    # features: (N, H, W, 512)  ==  torch 'n d h w' rearranged to 'n h w d'
    N, H, W, C = x.shape
    project_features = x.reshape(N, H * W, C).astype(jnp.float32)   # flatten(1, 2)
    pos_embeddings = sine_position_embedding(N, H, W, pos_dim)
    return project_features, pos_embeddings


# ----------------------------------------------------------------------------

if __name__ == "__main__":
    key = jax.random.PRNGKey(0)
    k_param, k_input = jax.random.split(key)

    params = init_resnet18_params(k_param)
    pos_dim = 64

    # small input consistent with the module: batch=2, 3-channel 64x64 image
    face = jax.random.normal(k_input, (2, 3, 64, 64), dtype=jnp.float32)

    proj, pos = image_encoder_forward(face, params, pos_dim)
    proj = jax.block_until_ready(proj)
    pos = jax.block_until_ready(pos)

    assert proj.shape == (2, 4, 512), proj.shape     # 64x64 input -> 2x2 feature map
    assert pos.shape == (2, 4, pos_dim), pos.shape
    assert bool(jnp.isfinite(proj).all()) and bool(jnp.isfinite(pos).all())

    print("KERNEL_OK")
</pallas_src>

<mosaic_0001>
module attributes {stable_mosaic.version = 11 : i64} {
  func.func @_mm_bn_kernel(%arg0: i32, %arg1: i32, %arg2: memref<256x147xbf16, #tpu.memory_space<vmem>>, %arg3: memref<147x64xbf16, #tpu.memory_space<vmem>>, %arg4: memref<1x64xf32, #tpu.memory_space<vmem>>, %arg5: memref<256x64xbf16, #tpu.memory_space<vmem>>, %arg6: memref<256x64xf32, #tpu.memory_space<vmem>>) attributes {dimension_semantics = [#tpu.dimension_semantics<parallel>, #tpu.dimension_semantics<arbitrary>], iteration_bounds = array<i64: 8, 1>, scalar_prefetch = 0 : i64, scratch_operands = 1 : i64, tpu.core_type = #tpu.core_type<tc>, window_params = [{transform_indices = @transform_0, window_bounds = array<i64: 256, 147>}, {transform_indices = @transform_1, window_bounds = array<i64: 147, 64>}, {pipeline_mode = #tpu.pipeline_mode<synchronous>, transform_indices = @transform_2, window_bounds = array<i64: 1, 64>}, {transform_indices = @transform_3, window_bounds = array<i64: 256, 64>}]} {
    %c0_i32 = arith.constant 0 : i32
    %0 = arith.cmpi eq, %arg1, %c0_i32 : i32
    %1 = arith.extui %0 : i1 to i32
    %c0_i32_0 = arith.constant 0 : i32
    %2 = arith.cmpi ne, %1, %c0_i32_0 : i32
    scf.if %2 {
      %cst_10 = arith.constant 0.000000e+00 : f32
      %12 = vector.broadcast %cst_10 : f32 to vector<256x64xf32>
      %c0_11 = arith.constant 0 : index
      %c0_12 = arith.constant 0 : index
      %13 = vector.load %arg6[%c0_11, %c0_12] : memref<256x64xf32, #tpu.memory_space<vmem>>, vector<256x64xf32>
      tpu.vector_store %arg6[%c0_11, %c0_12], %12 {strides = array<i32>} : memref<256x64xf32, #tpu.memory_space<vmem>>, vector<256x64xf32>,
    } else {
    }
    %c0 = arith.constant 0 : index
    %c0_1 = arith.constant 0 : index
    %3 = vector.load %arg6[%c0, %c0_1] : memref<256x64xf32, #tpu.memory_space<vmem>>, vector<256x64xf32>
    %c0_2 = arith.constant 0 : index
    %c0_3 = arith.constant 0 : index
    %4 = vector.load %arg2[%c0_2, %c0_3] : memref<256x147xbf16, #tpu.memory_space<vmem>>, vector<256x147xbf16>
    %c0_4 = arith.constant 0 : index
    %c0_5 = arith.constant 0 : index
    %5 = vector.load %arg3[%c0_4, %c0_5] : memref<147x64xbf16, #tpu.memory_space<vmem>>, vector<147x64xbf16>
    %cst = arith.constant dense<0.000000e+00> : vector<256x64xf32>
    %6 = tpu.matmul %4, %5, %cst {dimension_numbers = #tpu.dot_dimension_numbers<[1], [0], [0], [1], [0, 0, 1, 1], [], []>} : vector<256x147xbf16>, vector<147x64xbf16>, vector<256x64xf32> -> vector<256x64xf32>
    %7 = arith.addf %3, %6 : vector<256x64xf32>
    %c0_6 = arith.constant 0 : index
    %c0_7 = arith.constant 0 : index
    %8 = vector.load %arg6[%c0_6, %c0_7] : memref<256x64xf32, #tpu.memory_space<vmem>>, vector<256x64xf32>
    tpu.vector_store %arg6[%c0_6, %c0_7], %7 {strides = array<i32>} : memref<256x64xf32, #tpu.memory_space<vmem>>, vector<256x64xf32>,
    %c0_i32_8 = arith.constant 0 : i32
    %9 = arith.cmpi eq, %arg1, %c0_i32_8 : i32
    %10 = arith.extui %9 : i1 to i32
    %c0_i32_9 = arith.constant 0 : i32
    %11 = arith.cmpi ne, %10, %c0_i32_9 : i32
    scf.if %11 {
      %c0_10 = arith.constant 0 : index
      %c0_11 = arith.constant 0 : index
      %12 = vector.load %arg6[%c0_10, %c0_11] : memref<256x64xf32, #tpu.memory_space<vmem>>, vector<256x64xf32>
      %c0_12 = arith.constant 0 : index
      %c0_13 = arith.constant 0 : index
      %13 = vector.load %arg4[%c0_12, %c0_13] : memref<1x64xf32, #tpu.memory_space<vmem>>, vector<1x64xf32>
      %14 = vector.broadcast %13 : vector<1x64xf32> to vector<256x64xf32>
      %15 = arith.addf %12, %14 : vector<256x64xf32>
      %cst_14 = arith.constant 0.000000e+00 : f32
      %16 = vector.broadcast %cst_14 : f32 to vector<256x64xf32>
      %17 = arith.maximumf %15, %16 : vector<256x64xf32>
      %18 = arith.truncf %17 : vector<256x64xf32> to vector<256x64xbf16>
      %c0_15 = arith.constant 0 : index
      %c0_16 = arith.constant 0 : index
      %19 = vector.load %arg5[%c0_15, %c0_16] : memref<256x64xbf16, #tpu.memory_space<vmem>>, vector<256x64xbf16>
      tpu.vector_store %arg5[%c0_15, %c0_16], %18 {strides = array<i32>} : memref<256x64xbf16, #tpu.memory_space<vmem>>, vector<256x64xbf16>,
    } else {
    }
    return
  }
  func.func @transform_0(%arg0: i32, %arg1: i32) -> (i32, i32) {
    %c0_i32 = arith.constant 0 : i32
    return %arg0, %arg1 : i32, i32
  }
  func.func @transform_1(%arg0: i32, %arg1: i32) -> (i32, i32) {
    %c0_i32 = arith.constant 0 : i32
    %c0_i32_0 = arith.constant 0 : i32
    return %arg1, %c0_i32 : i32, i32
  }
  func.func @transform_2(%arg0: i32, %arg1: i32) -> (i32, i32) {
    %c0_i32 = arith.constant 0 : i32
    %c0_i32_0 = arith.constant 0 : i32
    %c0_i32_1 = arith.constant 0 : i32
    return %c0_i32, %c0_i32_0 : i32, i32
  }
  func.func @transform_3(%arg0: i32, %arg1: i32) -> (i32, i32) {
    %c0_i32 = arith.constant 0 : i32
    %c0_i32_0 = arith.constant 0 : i32
    return %arg0, %c0_i32 : i32, i32
  }
}

</mosaic_0001>

<bundles_post_ra>
// kernel: tpu_custom_call.1
= control target key start
LH: loop header
LB: loop body
LE: loop exit
PB: predicated region body
PF: predicated region fallthrough
CT: control target
= control target key end

     0   :  { %s1473_s12 = smov 0   ;;  %s1475_s13 = smov 0   ;;  %s1779_s0 = inlined_call_operand.vmem [shape: bf16[2048,147], index: 0, kind: input, shape index: {}]   ;;  %s1780_s1 = inlined_call_operand.vmem [shape: bf16[147,64], index: 1, kind: input, shape index: {}]   ;;  %s1781_s2 = inlined_call_operand.vmem [shape: f32[1,64], index: 2, kind: input, shape index: {}]   ;;  %s1782_s3 = inlined_call_operand.vmem [shape: bf16[2048,64], index: 3, kind: output, shape index: {}]  }
   0x1   :  { %s1477_s14 = smov 0  }
   0x2 LB: > { %s25_s15 = sadd.s32 1, %s1444_s13  ;;  %p1189_p0 = scmp.ge.s32.totalorder %s1448_s14, 1  ;;  %s1448_s14 = sphi %s1477_s14, %s13_s14   ;;  %s1444_s13 = sphi %s1475_s13, %s1784_s13   ;;  %s1440_s12 = sphi %s1473_s12, %s1783_s12  }
   0x3   : > { %p27_p1 = scmp.ge.s32.totalorder %s25_s15, 8  ;;  %p169_p2 = scmp.lt.s32.totalorder %s1448_s14, 9 }
   0x5   : > { %s1786_s15 = smov (%p27_p1, %s25_s15), 0  ;;  %p170_p3 = pnand %p1189_p0, %p169_p2 }
   0x6   : > { %v1368_v0 = vld [vmem:[%s1780_s1] sm:$0xff] (!%p170_p3)   ;;  %v1450_v1 = vmov (!%p170_p3), 0   ;;  %v1369_v2 = vld [vmem:[%s1780_s1 + $0x8] sm:$0xff] (!%p170_p3)   ;;  %v1370_v3 = vld [vmem:[%s1780_s1 + $0x10] sm:$0xff] (!%p170_p3)   ;;  %s1190_s22 = sshll.u32 (!%p170_p3), %s1440_s12, 5  ;;  %vm232_vm0 = vcmask (!%p170_p3), 523264  }
   0x7   : > { %173 = sbr.rel (%p170_p3) target bundleno = 337 (0x151), region = 32  ;;  %605 = vmatprep.subr.bf16.mxu0 (!%p170_p3), %v1450_v1  ;;  %1321 = vmatprep.subr.bf16.mxu1 (!%p170_p3), %v1450_v1  ;;  %p205_p4 = scmp.lt.s32.totalorder (!%p170_p3), %s1190_s22, 255  ;;  %v1371_v4 = vld [vmem:[%s1780_s1 + $0x18] sm:$0xff] (!%p170_p3)   ;;  %v1451_v5 = vmov (!%p170_p3), 0.0   ;;  %v1372_v6 = vld [vmem:[%s1780_s1 + $0x20] sm:$0xff] (!%p170_p3)   ;;  %vm549_vm1 = vcmask (!%p170_p3), 154624  }
   0x8   : > { %606 = vmatpush1.bf16.msra.mxu0 (!%p170_p3), %v1368_v0  ;;  %1331 = vmatpush1.bf16.msra.mxu1 (!%p170_p3), %v1368_v0  ;;  %233 = vst.msk [vmem:[#allocation2] sm:$0xff] (!%p170_p3), %vm232_vm0, %v1451_v5  ;;  %234 = vst.msk [vmem:[#allocation2 + $0x8] sm:$0xff] (!%p170_p3), %vm232_vm0, %v1451_v5  ;;  %v1373_v9 = vld [vmem:[%s1780_s1 + $0x28] sm:$0xff] (!%p170_p3)   ;;  %v1374_v10 = vld [vmem:[%s1780_s1 + $0x30] sm:$0xff] (!%p170_p3)   ;;  %vm598_vm2 = vcmask (!%p170_p3), 1040384   ;;  %vm599_vm3 = vcmask (!%p170_p3), 1041408  }
   0x9   : > { %607 = vmatprep.subr.bf16.mxu0 (!%p170_p3), %v1450_v1  ;;  %1322 = vmatprep.subr.bf16.mxu1 (!%p170_p3), %v1450_v1  ;;  %235 = vst.msk [vmem:[#allocation2 + $0x10] sm:$0xff] (!%p170_p3), %vm232_vm0, %v1451_v5  ;;  %236 = vst.msk [vmem:[#allocation2 + $0x18] sm:$0xff] (!%p170_p3), %vm232_vm0, %v1451_v5  ;;  %v1375_v11 = vld [vmem:[%s1780_s1 + $0x38] sm:$0xff] (!%p170_p3)   ;;  %v1452_v12 = vmov (!%p170_p3), 65535   ;;  %v1376_v14 = vld [vmem:[%s1780_s1 + $0x40] sm:$0xff] (!%p170_p3)   ;;  %vm1065_vm4 = vcmask (!%p170_p3), 519168  }
   0xa   : > { %237 = vst.msk [vmem:[#allocation2 + $0x20] sm:$0xff] (!%p170_p3), %vm232_vm0, %v1451_v5  ;;  %238 = vst.msk [vmem:[#allocation2 + $0x28] sm:$0xff] (!%p170_p3), %vm232_vm0, %v1451_v5  ;;  %v600_v13 = vsel (!%p170_p3), %vm598_vm2, 4294967295, %v1452_v12  ;;  %v1377_v15 = vld [vmem:[%s1780_s1 + $0x48] ss:$0 sps:$4 sm:$0x33] (!%p170_p3)  }
   0xb   : > { %239 = vst.msk [vmem:[#allocation2 + $0x30] sm:$0xff] (!%p170_p3), %vm232_vm0, %v1451_v5  ;;  %240 = vst.msk [vmem:[#allocation2 + $0x38] sm:$0xff] (!%p170_p3), %vm232_vm0, %v1451_v5  ;;  %v601_v16 = vsel (!%p170_p3), %vm599_vm3, %v600_v13, 0 }
   0xc   : > { %608 = vmatpush1.bf16.msra.mxu0 (!%p170_p3), %v1369_v2  ;;  %1332 = vmatpush1.bf16.msra.mxu1 (!%p170_p3), %v1369_v2  ;;  %241 = vst.msk [vmem:[#allocation2 + $0x40] sm:$0xff] (!%p170_p3), %vm232_vm0, %v1451_v5  ;;  %242 = vst.msk [vmem:[#allocation2 + $0x48] sm:$0xff] (!%p170_p3), %vm232_vm0, %v1451_v5  ;;  %v603_v17 = vand.u32 (!%p170_p3), %v1377_v15, %v601_v16  ;;  %v1638_v2 = vld [vmem:[%s1781_s2] ss:$0 sm:$0xff] (!%p170_p3) }
   0xd   : > { %609 = vmatprep.subr.bf16.mxu0 (!%p170_p3), %v1450_v1  ;;  %1323 = vmatprep.subr.bf16.mxu1 (!%p170_p3), %v1450_v1  ;;  %243 = vst.msk [vmem:[#allocation2 + $0x50] sm:$0xff] (!%p170_p3), %vm232_vm0, %v1451_v5  ;;  %244 = vst.msk [vmem:[#allocation2 + $0x58] sm:$0xff] (!%p170_p3), %vm232_vm0, %v1451_v5 }
   0xe   : > { %s1788_s22 = smov (!%p205_p4, %s1190_s22), 255  ;;  %245 = vst.msk [vmem:[#allocation2 + $0x60] sm:$0xff] %vm232_vm0, %v1451_v5  ;;  %246 = vst.msk [vmem:[#allocation2 + $0x68] sm:$0xff] %vm232_vm0, %v1451_v5 }
   0xf   : > { %s1288_s25 = sshll.u32 %s1788_s22, 3  ;;  %247 = vst.msk [vmem:[#allocation2 + $0x70] sm:$0xff] %vm232_vm0, %v1451_v5  ;;  %248 = vst.msk [vmem:[#allocation2 + $0x78] sm:$0xff] %vm232_vm0, %v1451_v5  ;;  %v265_v48 = vld [vmem:[#allocation2] sm:$0xff]  ;;  %v266_v52 = vld [vmem:[#allocation2 + $0x8] sm:$0xff]  ;;  %s1194_s19 = sshll.u32 %s1788_s22, 2 }
  0x10   : > { %610 = vmatpush1.bf16.msra.mxu0 %v1370_v3  ;;  %1333 = vmatpush1.bf16.msra.mxu1 %v1370_v3  ;;  %249 = vst.msk [vmem:[#allocation2 + $0x80] sm:$0xff] %vm232_vm0, %v1451_v5  ;;  %250 = vst.msk [vmem:[#allocation2 + $0x88] sm:$0xff] %vm232_vm0, %v1451_v5  ;;  %s1551_s28 = scalar_lea.vmem %s1779_s0, %s1288_s25  ;;  %v267_v0 = vld [vmem:[#allocation2 + $0x10] sm:$0xff]  ;;  %s1652_s22 = scalar_lea.vmem %s1782_s3, %s1194_s19 }
  0x11   : > { %611 = vmatprep.subr.bf16.mxu0 %v1450_v1  ;;  %1324 = vmatprep.subr.bf16.mxu1 %v1450_v1  ;;  %251 = vst.msk [vmem:[#allocation2 + $0x90] sm:$0xff] %vm232_vm0, %v1451_v5  ;;  %252 = vst.msk [vmem:[#allocation2 + $0x98] sm:$0xff] %vm232_vm0, %v1451_v5  ;;  %v1380_v7 = vld [vmem:[%s1551_s28 + $0x4] ss:$8 sps:$4 sm:$0xff]   ;;  %v1378_v18 = vld [vmem:[%s1551_s28] ss:$8 sps:$4 sm:$0xff]  }
  0x12   : > { %253 = vst.msk [vmem:[#allocation2 + $0xa0] sm:$0xff] %vm232_vm0, %v1451_v5  ;;  %254 = vst.msk [vmem:[#allocation2 + $0xa8] sm:$0xff] %vm232_vm0, %v1451_v5  ;;  %v1383_v8 = vld [vmem:[%s1551_s28 + $0x84] ss:$8 sps:$4 sm:$0xff]   ;;  %1237 = vmatprep.mubr.msk.bf16.mxu0 %vm549_vm1, %v1380_v7  ;;  %v1381_v19 = vld [vmem:[%s1551_s28 + $0x80] ss:$8 sps:$4 sm:$0xff]  }
  0x13   : > { %255 = vst.msk [vmem:[#allocation2 + $0xb0] sm:$0xff] %vm232_vm0, %v1451_v5  ;;  %256 = vst.msk [vmem:[#allocation2 + $0xb8] sm:$0xff] %vm232_vm0, %v1451_v5  ;;  %1245 = vmatprep.mubr.msk.bf16.mxu1 %vm549_vm1, %v1383_v8  ;;  %v1384_v20 = vld [vmem:[%s1551_s28 + $0x14] ss:$8 sps:$4 sm:$0xff]   ;;  %v1388_v22 = vld [vmem:[%s1551_s28 + $0x10] ss:$8 sps:$4 sm:$0xff]  }
  0x14   : > { %257 = vst.msk [vmem:[#allocation2 + $0xc0] sm:$0xff] %vm232_vm0, %v1451_v5  ;;  %258 = vst.msk [vmem:[#allocation2 + $0xc8] sm:$0xff] %vm232_vm0, %v1451_v5  ;;  %612 = vmatpush1.bf16.msra.mxu0 %v1371_v4  ;;  %1334 = vmatpush1.bf16.msra.mxu1 %v1371_v4  ;;  %v1386_v21 = vld [vmem:[%s1551_s28 + $0x94] ss:$8 sps:$4 sm:$0xff]   ;;  %v1389_v23 = vld [vmem:[%s1551_s28 + $0x90] ss:$8 sps:$4 sm:$0xff]  }
  0x15   : > { %259 = vst.msk [vmem:[#allocation2 + $0xd0] sm:$0xff] %vm232_vm0, %v1451_v5  ;;  %260 = vst.msk [vmem:[#allocation2 + $0xd8] sm:$0xff] %vm232_vm0, %v1451_v5  ;;  %613 = vmatprep.subr.bf16.mxu0 %v1450_v1  ;;  %1325 = vmatprep.subr.bf16.mxu1 %v1450_v1  ;;  %v1390_v24 = vld [vmem:[%s1551_s28 + $0x24] ss:$8 sps:$4 sm:$0xff]   ;;  %v1394_v26 = vld [vmem:[%s1551_s28 + $0x20] ss:$8 sps:$4 sm:$0xff]  }
  0x16   : > { %261 = vst.msk [vmem:[#allocation2 + $0xe0] sm:$0xff] %vm232_vm0, %v1451_v5  ;;  %262 = vst.msk [vmem:[#allocation2 + $0xe8] sm:$0xff] %vm232_vm0, %v1451_v5  ;;  %v1392_v25 = vld [vmem:[%s1551_s28 + $0xa4] ss:$8 sps:$4 sm:$0xff]   ;;  %v1395_v27 = vld [vmem:[%s1551_s28 + $0xa0] ss:$8 sps:$4 sm:$0xff]  }
  0x17   : > { %263 = vst.msk [vmem:[#allocation2 + $0xf0] sm:$0xff] %vm232_vm0, %v1451_v5  ;;  %264 = vst.msk [vmem:[#allocation2 + $0xf8] sm:$0xff] %vm232_vm0, %v1451_v5  ;;  %v1396_v28 = vld [vmem:[%s1551_s28 + $0x34] ss:$8 sps:$4 sm:$0xff]   ;;  %v1400_v30 = vld [vmem:[%s1551_s28 + $0x30] ss:$8 sps:$4 sm:$0xff]  }
  0x18   : > { %614 = vmatpush1.bf16.msra.mxu0 %v1372_v6  ;;  %1335 = vmatpush1.bf16.msra.mxu1 %v1372_v6  ;;  %v1398_v29 = vld [vmem:[%s1551_s28 + $0xb4] ss:$8 sps:$4 sm:$0xff]   ;;  %v1401_v31 = vld [vmem:[%s1551_s28 + $0xb0] ss:$8 sps:$4 sm:$0xff]   ;;  %v1402_v32 = vld [vmem:[%s1551_s28 + $0x44] ss:$8 sps:$4 sm:$0xff]  }
  0x19   : > { %615 = vmatprep.subr.bf16.mxu0 %v1450_v1  ;;  %1326 = vmatprep.subr.bf16.mxu1 %v1450_v1  ;;  %v1404_v33 = vld [vmem:[%s1551_s28 + $0xc4] ss:$8 sps:$4 sm:$0xff]   ;;  %v1406_v34 = vld [vmem:[%s1551_s28 + $0x40] ss:$8 sps:$4 sm:$0xff]   ;;  %v1408_v36 = vld [vmem:[%s1551_s28 + $0x54] ss:$8 sps:$4 sm:$0xff]  }
  0x1a   : > { %v1407_v35 = vld [vmem:[%s1551_s28 + $0xc0] ss:$8 sps:$4 sm:$0xff]   ;;  %v1410_v37 = vld [vmem:[%s1551_s28 + $0xd4] ss:$8 sps:$4 sm:$0xff]   ;;  %v1412_v38 = vld [vmem:[%s1551_s28 + $0x50] ss:$8 sps:$4 sm:$0xff]  }
  0x1b   : > { %v1413_v39 = vld [vmem:[%s1551_s28 + $0xd0] ss:$8 sps:$4 sm:$0xff]   ;;  %v1414_v40 = vld [vmem:[%s1551_s28 + $0x64] ss:$8 sps:$4 sm:$0xff]   ;;  %v1418_v42 = vld [vmem:[%s1551_s28 + $0x60] ss:$8 sps:$4 sm:$0xff]  }
  0x1c   : > { %616 = vmatpush1.bf16.msra.mxu0 %v1373_v9  ;;  %1336 = vmatpush1.bf16.msra.mxu1 %v1373_v9  ;;  %v1416_v41 = vld [vmem:[%s1551_s28 + $0xe4] ss:$8 sps:$4 sm:$0xff]   ;;  %v1419_v43 = vld [vmem:[%s1551_s28 + $0xe0] ss:$8 sps:$4 sm:$0xff]   ;;  %v1420_v44 = vld [vmem:[%s1551_s28 + $0x74] ss:$8 sps:$4 sm:$0xff]  }
  0x1d   : > { %617 = vmatprep.subr.bf16.mxu0 %v1450_v1  ;;  %1327 = vmatprep.subr.bf16.mxu1 %v1450_v1  ;;  %v1422_v45 = vld [vmem:[%s1551_s28 + $0xf4] ss:$8 sps:$4 sm:$0xff]   ;;  %v1424_v46 = vld [vmem:[%s1551_s28 + $0x70] ss:$8 sps:$4 sm:$0xff]   ;;  %v281_v49 = vld [vmem:[#allocation2 + $0x80] sm:$0xff] }
  0x1e   : > { %v1425_v47 = vld [vmem:[%s1551_s28 + $0xf0] ss:$8 sps:$4 sm:$0xff]   ;;  %v282_v53 = vld [vmem:[#allocation2 + $0x88] sm:$0xff] }
  0x1f   : > { %v268_v5 = vld [vmem:[#allocation2 + $0x18] sm:$0xff] }
  0x20   : > { %618 = vmatpush1.bf16.msra.mxu0 %v1374_v10  ;;  %1337 = vmatpush1.bf16.msra.mxu1 %v1374_v10  ;;  %v284_v6 = vld [vmem:[#allocation2 + $0x98] sm:$0xff] }
  0x21   : > { %619 = vmatprep.subr.bf16.mxu0 %v1450_v1  ;;  %1328 = vmatprep.subr.bf16.mxu1 %v1450_v1 }
  0x24   : > { %620 = vmatpush1.bf16.msra.mxu0 %v1375_v11  ;;  %1338 = vmatpush1.bf16.msra.mxu1 %v1375_v11 }
  0x25   : > { %621 = vmatprep.subr.bf16.mxu0 %v1450_v1  ;;  %1329 = vmatprep.subr.bf16.mxu1 %v1450_v1 }
  0x28   : > { %622 = vmatpush1.bf16.msra.mxu0 %v1376_v14  ;;  %1339 = vmatpush1.bf16.msra.mxu1 %v1376_v14 }
  0x29   : > { %623 = vmatprep.subr.bf16.mxu0 %v1450_v1  ;;  %1330 = vmatprep.subr.bf16.mxu1 %v1450_v1  ;;  %v283_v1 = vld [vmem:[#allocation2 + $0x90] sm:$0xff] }
  0x2c   : > { %624 = vmatpush1.bf16.msra.mxu0 %v603_v17  ;;  %1340 = vmatpush1.bf16.msra.mxu1 %v603_v17 }
  0x2f   : > { %638 = vmatmul.mubr.bf16.vlgmr.msra.gmra.mrb[0].mxu0 %v1378_v18  ;;  %702 = vmatmul.mubr.bf16.vlgmr.msra.gmra.mrb[0].mxu1 %v1381_v19 }
  0x30   : > { %1238 = vmatprep.mubr.msk.bf16.mxu0 %vm549_vm1, %v1384_v20  ;;  %1246 = vmatprep.mubr.msk.bf16.mxu1 %vm549_vm1, %v1386_v21 }
  0x37   : > { %646 = vmatmul.mubr.bf16.gmra.mrb[4].mxu0 %v1388_v22  ;;  %710 = vmatmul.mubr.bf16.gmra.mrb[4].mxu1 %v1389_v23 }
  0x38   : > { %1239 = vmatprep.mubr.msk.bf16.mxu0 %vm549_vm1, %v1390_v24  ;;  %1247 = vmatprep.mubr.msk.bf16.mxu1 %vm549_vm1, %v1392_v25 }
  0x3f   : > { %654 = vmatmul.mubr.bf16.gmra.mrb[8].mxu0 %v1394_v26  ;;  %718 = vmatmul.mubr.bf16.gmra.mrb[8].mxu1 %v1395_v27  ;;  %v269_v27 = vld [vmem:[#allocation2 + $0x20] sm:$0xff] }
  0x40   : > { %1240 = vmatprep.mubr.msk.bf16.mxu0 %vm549_vm1, %v1396_v28  ;;  %1248 = vmatprep.mubr.msk.bf16.mxu1 %vm549_vm1, %v1398_v29  ;;  %v285_v28 = vld [vmem:[#allocation2 + $0xa0] sm:$0xff] }
  0x47   : > { %662 = vmatmul.mubr.bf16.gmra.mrb[12].mxu0 %v1400_v30  ;;  %726 = vmatmul.mubr.bf16.gmra.mrb[12].mxu1 %v1401_v31 }
  0x48   : > { %1241 = vmatprep.mubr.msk.bf16.mxu0 %vm549_vm1, %v1402_v32  ;;  %1249 = vmatprep.mubr.msk.bf16.mxu1 %vm549_vm1, %v1404_v33 }
  0x4f   : > { %670 = vmatmul.mubr.bf16.gmra.mrb[16].mxu0 %v1406_v34  ;;  %734 = vmatmul.mubr.bf16.gmra.mrb[16].mxu1 %v1407_v35  ;;  %v270_v35 = vld [vmem:[#allocation2 + $0x28] sm:$0xff] }
  0x50   : > { %1242 = vmatprep.mubr.msk.bf16.mxu0 %vm549_vm1, %v1408_v36  ;;  %1250 = vmatprep.mubr.msk.bf16.mxu1 %vm549_vm1, %v1410_v37  ;;  %v286_v36 = vld [vmem:[#allocation2 + $0xa8] sm:$0xff] }
  0x57   : > { %678 = vmatmul.mubr.bf16.gmra.mrb[20].mxu0 %v1412_v38  ;;  %742 = vmatmul.mubr.bf16.gmra.mrb[20].mxu1 %v1413_v39 }
  0x58   : > { %1243 = vmatprep.mubr.msk.bf16.mxu0 %vm549_vm1, %v1414_v40  ;;  %1251 = vmatprep.mubr.msk.bf16.mxu1 %vm549_vm1, %v1416_v41 }
  0x5f   : > { %686 = vmatmul.mubr.bf16.gmra.mrb[24].mxu0 %v1418_v42  ;;  %750 = vmatmul.mubr.bf16.gmra.mrb[24].mxu1 %v1419_v43 }
  0x60   : > { %1244 = vmatprep.mubr.msk.bf16.mxu0 %vm549_vm1, %v1420_v44  ;;  %1252 = vmatprep.mubr.msk.bf16.mxu1 %vm549_vm1, %v1422_v45 }
  0x67   : > { %694 = vmatmul.mubr.bf16.gmra.mrb[28].mxu0 %v1424_v46  ;;  %758 = vmatmul.mubr.bf16.gmra.mrb[28].mxu1 %v1425_v47 }
 0x102   : > { %v639_v50 = vpop.f32.mrb[0].mxu0  ;;  %v703_v51 = vpop.f32.mrb[0].mxu1 }
 0x103   : > { %v766_v54 = vadd.f32 %v639_v50, %v265_v48  ;;  %v782_v55 = vadd.f32 %v703_v51, %v281_v49  ;;  %v641_v56 = vpop.f32.mrb[1].mxu0  ;;  %v705_v57 = vpop.f32.mrb[1].mxu1 }
 0x104   : > { %v642_v58 = vpop.f32.mrb[2].mxu0  ;;  %v706_v59 = vpop.f32.mrb[2].mxu1 }
 0x105   : > { %799 = vst.msk [vmem:[#allocation2] sm:$0xff] %vm232_vm0, %v766_v54  ;;  %815 = vst.msk [vmem:[#allocation2 + $0x80] sm:$0xff] %vm232_vm0, %v782_v55  ;;  %v767_v60 = vadd.f32 %v642_v58, %v266_v52  ;;  %v783_v61 = vadd.f32 %v706_v59, %v282_v53  ;;  %v644_v62 = vpop.f32.mrb[3].mxu0  ;;  %v708_v63 = vpop.f32.mrb[3].mxu1  ;;  %v271_v59 = vld [vmem:[#allocation2 + $0x30] sm:$0xff] }
 0x107   : > { %800 = vst.msk [vmem:[#allocation2 + $0x8] sm:$0xff] %vm232_vm0, %v767_v60  ;;  %816 = vst.msk [vmem:[#allocation2 + $0x88] sm:$0xff] %vm232_vm0, %v783_v61  ;;  %v287_v60 = vld [vmem:[#allocation2 + $0xb0] sm:$0xff] }
 0x10a   : > { %v647_v3 = vpop.f32.mrb[4].mxu0  ;;  %v711_v4 = vpop.f32.mrb[4].mxu1 }
 0x10b   : > { %v768_v7 = vadd.f32 %v647_v3, %v267_v0  ;;  %v784_v8 = vadd.f32 %v711_v4, %v283_v1  ;;  %v649_v9 = vpop.f32.mrb[5].mxu0  ;;  %v713_v10 = vpop.f32.mrb[5].mxu1  ;;  %v272_v4 = vld [vmem:[#allocation2 + $0x38] sm:$0xff] }
 0x10c   : > { %v834_v11 = vld [vmem:[#allocation2] sm:$0xff]  ;;  %v650_v13 = vpop.f32.mrb[6].mxu0  ;;  %v714_v14 = vpop.f32.mrb[6].mxu1 }
 0x10d   : > { %v850_v12 = vld [vmem:[#allocation2 + $0x80] sm:$0xff]  ;;  %v873_v15 = vadd.f32 %v1638_v2, %v834_v11  ;;  %801 = vst.msk [vmem:[#allocation2 + $0x10] sm:$0xff] %vm232_vm0, %v768_v7  ;;  %817 = vst.msk [vmem:[#allocation2 + $0x90] sm:$0xff] %vm232_vm0, %v784_v8  ;;  %v769_v17 = vadd.f32 %v650_v13, %v268_v5  ;;  %v785_v18 = vadd.f32 %v714_v14, %v284_v6  ;;  %v652_v19 = vpop.f32.mrb[7].mxu0  ;;  %v716_v20 = vpop.f32.mrb[7].mxu1  ;;  %v288_v5 = vld [vmem:[#allocation2 + $0xb8] sm:$0xff] }
 0x10e   : > { %v889_v16 = vadd.f32 %v1638_v2, %v850_v12  ;;  %v835_v21 = vld [vmem:[#allocation2 + $0x8] sm:$0xff] }
 0x10f   : > { %v851_v22 = vld [vmem:[#allocation2 + $0x88] sm:$0xff]  ;;  %v905_v23 = vmax.f32 %v873_v15, 0.0  ;;  %v874_v25 = vadd.f32 %v1638_v2, %v835_v21  ;;  %802 = vst.msk [vmem:[#allocation2 + $0x18] sm:$0xff] %vm232_vm0, %v769_v17  ;;  %818 = vst.msk [vmem:[#allocation2 + $0x98] sm:$0xff] %vm232_vm0, %v785_v18 }
 0x110   : > { %v921_v24 = vmax.f32 %v889_v16, 0.0  ;;  %v890_v26 = vadd.f32 %v1638_v2, %v851_v22 }
 0x111   : > { %v1289_v29 = vpack.c.bf16 %v905_v23, %v905_v23  ;;  %v906_v31 = vmax.f32 %v874_v25, 0.0 }
 0x112   : > { %v1305_v30 = vpack.c.bf16 %v921_v24, %v921_v24  ;;  %v922_v32 = vmax.f32 %v890_v26, 0.0  ;;  %v655_v33 = vpop.f32.mrb[8].mxu0  ;;  %v719_v34 = vpop.f32.mrb[8].mxu1 }
 0x113   : > { %1066 = vst.msk [vmem:[%s1652_s22] sm:$0xf] %vm1065_vm4, %v1289_v29  ;;  %v1290_v37 = vpack.c.bf16 %v906_v31, %v906_v31  ;;  %v770_v39 = vadd.f32 %v655_v33, %v269_v27  ;;  %v786_v40 = vadd.f32 %v719_v34, %v285_v28  ;;  %v657_v41 = vpop.f32.mrb[9].mxu0  ;;  %v721_v42 = vpop.f32.mrb[9].mxu1  ;;  %v273_v28 = vld [vmem:[#allocation2 + $0x40] sm:$0xff] }
 0x114   : > { %1082 = vst.msk [vmem:[%s1652_s22 + $0x40] sm:$0xf] %vm1065_vm4, %v1305_v30  ;;  %v1306_v38 = vpack.c.bf16 %v922_v32, %v922_v32  ;;  %v836_v43 = vld [vmem:[#allocation2 + $0x10] sm:$0xff]  ;;  %v658_v45 = vpop.f32.mrb[10].mxu0  ;;  %v722_v46 = vpop.f32.mrb[10].mxu1  ;;  %v289_v29 = vld [vmem:[#allocation2 + $0xc0] sm:$0xff] }
 0x115   : > { %v852_v44 = vld [vmem:[#allocation2 + $0x90] sm:$0xff]  ;;  %1067 = vst.msk [vmem:[%s1652_s22 + $0x4] sm:$0xf] %vm1065_vm4, %v1290_v37  ;;  %v875_v47 = vadd.f32 %v1638_v2, %v836_v43  ;;  %v771_v49 = vadd.f32 %v658_v45, %v270_v35  ;;  %v787_v50 = vadd.f32 %v722_v46, %v286_v36  ;;  %v660_v51 = vpop.f32.mrb[11].mxu0  ;;  %v724_v52 = vpop.f32.mrb[11].mxu1  ;;  %v274_v36 = vld [vmem:[#allocation2 + $0x48] sm:$0xff] }
 0x116   : > { %1083 = vst.msk [vmem:[%s1652_s22 + $0x44] sm:$0xf] %vm1065_vm4, %v1306_v38  ;;  %v891_v48 = vadd.f32 %v1638_v2, %v852_v44  ;;  %v837_v53 = vld [vmem:[#allocation2 + $0x18] sm:$0xff]  ;;  %v290_v37 = vld [vmem:[#allocation2 + $0xc8] sm:$0xff] }
 0x117   : > { %803 = vst.msk [vmem:[#allocation2 + $0x20] sm:$0xff] %vm232_vm0, %v770_v39  ;;  %819 = vst.msk [vmem:[#allocation2 + $0xa0] sm:$0xff] %vm232_vm0, %v786_v40  ;;  %v853_v54 = vld [vmem:[#allocation2 + $0x98] sm:$0xff]  ;;  %v907_v55 = vmax.f32 %v875_v47, 0.0  ;;  %v876_v57 = vadd.f32 %v1638_v2, %v837_v53 }
 0x118   : > { %v923_v56 = vmax.f32 %v891_v48, 0.0  ;;  %v892_v58 = vadd.f32 %v1638_v2, %v853_v54  ;;  %804 = vst.msk [vmem:[#allocation2 + $0x28] sm:$0xff] %vm232_vm0, %v771_v49  ;;  %820 = vst.msk [vmem:[#allocation2 + $0xa8] sm:$0xff] %vm232_vm0, %v787_v50 }
 0x119   : > { %v1291_v61 = vpack.c.bf16 %v907_v55, %v907_v55  ;;  %v908_v63 = vmax.f32 %v876_v57, 0.0 }
 0x11a   : > { %v1307_v62 = vpack.c.bf16 %v923_v56, %v923_v56  ;;  %v924_v0 = vmax.f32 %v892_v58, 0.0  ;;  %v663_v1 = vpop.f32.mrb[12].mxu0  ;;  %v727_v3 = vpop.f32.mrb[12].mxu1 }
 0x11b   : > { %1068 = vst.msk [vmem:[%s1652_s22 + $0x8] sm:$0xf] %vm1065_vm4, %v1291_v61  ;;  %v1292_v6 = vpack.c.bf16 %v908_v63, %v908_v63  ;;  %v772_v8 = vadd.f32 %v663_v1, %v271_v59  ;;  %v788_v9 = vadd.f32 %v727_v3, %v287_v60  ;;  %v665_v10 = vpop.f32.mrb[13].mxu0  ;;  %v729_v11 = vpop.f32.mrb[13].mxu1  ;;  %v275_v60 = vld [vmem:[#allocation2 + $0x50] sm:$0xff] }
 0x11c   : > { %1084 = vst.msk [vmem:[%s1652_s22 + $0x48] sm:$0xf] %vm1065_vm4, %v1307_v62  ;;  %v1308_v7 = vpack.c.bf16 %v924_v0, %v924_v0  ;;  %v666_v14 = vpop.f32.mrb[14].mxu0  ;;  %v730_v15 = vpop.f32.mrb[14].mxu1  ;;  %v291_v61 = vld [vmem:[#allocation2 + $0xd0] sm:$0xff] }
 0x11d   : > { %1069 = vst.msk [vmem:[%s1652_s22 + $0xc] sm:$0xf] %vm1065_vm4, %v1292_v6  ;;  %v773_v18 = vadd.f32 %v666_v14, %v272_v4  ;;  %v789_v19 = vadd.f32 %v730_v15, %v288_v5  ;;  %v668_v20 = vpop.f32.mrb[15].mxu0  ;;  %v732_v21 = vpop.f32.mrb[15].mxu1  ;;  %v276_v5 = vld [vmem:[#allocation2 + $0x58] sm:$0xff] }
 0x11e   : > { %v838_v12 = vld [vmem:[#allocation2 + $0x20] sm:$0xff]  ;;  %1085 = vst.msk [vmem:[%s1652_s22 + $0x4c] sm:$0xf] %vm1065_vm4, %v1308_v7  ;;  %v292_v6 = vld [vmem:[#allocation2 + $0xd8] sm:$0xff] }
 0x11f   : > { %v854_v13 = vld [vmem:[#allocation2 + $0xa0] sm:$0xff]  ;;  %v877_v16 = vadd.f32 %v1638_v2, %v838_v12  ;;  %805 = vst.msk [vmem:[#allocation2 + $0x30] sm:$0xff] %vm232_vm0, %v772_v8  ;;  %821 = vst.msk [vmem:[#allocation2 + $0xb0] sm:$0xff] %vm232_vm0, %v788_v9  ;;  %v839_v22 = vld [vmem:[#allocation2 + $0x28] sm:$0xff] }
 0x120   : > { %v893_v17 = vadd.f32 %v1638_v2, %v854_v13  ;;  %v855_v23 = vld [vmem:[#allocation2 + $0xa8] sm:$0xff]  ;;  %v878_v26 = vadd.f32 %v1638_v2, %v839_v22  ;;  %806 = vst.msk [vmem:[#allocation2 + $0x38] sm:$0xff] %vm232_vm0, %v773_v18  ;;  %822 = vst.msk [vmem:[#allocation2 + $0xb8] sm:$0xff] %vm232_vm0, %v789_v19 }
 0x121   : > { %v909_v24 = vmax.f32 %v877_v16, 0.0  ;;  %v894_v27 = vadd.f32 %v1638_v2, %v855_v23 }
 0x122   : > { %v925_v25 = vmax.f32 %v893_v17, 0.0  ;;  %v910_v32 = vmax.f32 %v878_v26, 0.0  ;;  %v671_v34 = vpop.f32.mrb[16].mxu0  ;;  %v735_v35 = vpop.f32.mrb[16].mxu1 }
 0x123   : > { %v1293_v30 = vpack.c.bf16 %v909_v24, %v909_v24  ;;  %v926_v33 = vmax.f32 %v894_v27, 0.0  ;;  %v774_v40 = vadd.f32 %v671_v34, %v273_v28  ;;  %v790_v41 = vadd.f32 %v735_v35, %v289_v29  ;;  %v673_v42 = vpop.f32.mrb[17].mxu0  ;;  %v737_v43 = vpop.f32.mrb[17].mxu1  ;;  %v277_v29 = vld [vmem:[#allocation2 + $0x60] sm:$0xff] }
 0x124   : > { %v1309_v31 = vpack.c.bf16 %v925_v25, %v925_v25  ;;  %v1294_v38 = vpack.c.bf16 %v910_v32, %v910_v32  ;;  %v674_v46 = vpop.f32.mrb[18].mxu0  ;;  %v738_v47 = vpop.f32.mrb[18].mxu1 }
 0x125   : > { %1070 = vst.msk [vmem:[%s1652_s22 + $0x10] sm:$0xf] %vm1065_vm4, %v1293_v30  ;;  %v1310_v39 = vpack.c.bf16 %v926_v33, %v926_v33  ;;  %v775_v50 = vadd.f32 %v674_v46, %v274_v36  ;;  %v791_v51 = vadd.f32 %v738_v47, %v290_v37  ;;  %v676_v52 = vpop.f32.mrb[19].mxu0  ;;  %v740_v53 = vpop.f32.mrb[19].mxu1  ;;  %v293_v30 = vld [vmem:[#allocation2 + $0xe0] sm:$0xff]  ;;  %v278_v37 = vld [vmem:[#allocation2 + $0x68] sm:$0xff] }
 0x126   : > { %1086 = vst.msk [vmem:[%s1652_s22 + $0x50] sm:$0xf] %vm1065_vm4, %v1309_v31  ;;  %v840_v44 = vld [vmem:[#allocation2 + $0x30] sm:$0xff]  ;;  %1071 = vst.msk [vmem:[%s1652_s22 + $0x14] sm:$0xf] %vm1065_vm4, %v1294_v38  ;;  %v294_v38 = vld [vmem:[#allocation2 + $0xe8] sm:$0xff] }
 0x127   : > { %v856_v45 = vld [vmem:[#allocation2 + $0xb0] sm:$0xff]  ;;  %1087 = vst.msk [vmem:[%s1652_s22 + $0x54] sm:$0xf] %vm1065_vm4, %v1310_v39  ;;  %v879_v48 = vadd.f32 %v1638_v2, %v840_v44  ;;  %v841_v54 = vld [vmem:[#allocation2 + $0x38] sm:$0xff] }
 0x128   : > { %v895_v49 = vadd.f32 %v1638_v2, %v856_v45  ;;  %807 = vst.msk [vmem:[#allocation2 + $0x40] sm:$0xff] %vm232_vm0, %v774_v40  ;;  %823 = vst.msk [vmem:[#allocation2 + $0xc0] sm:$0xff] %vm232_vm0, %v790_v41  ;;  %v857_v55 = vld [vmem:[#allocation2 + $0xb8] sm:$0xff]  ;;  %v880_v58 = vadd.f32 %v1638_v2, %v841_v54 }
 0x129   : > { %v911_v56 = vmax.f32 %v879_v48, 0.0  ;;  %v896_v59 = vadd.f32 %v1638_v2, %v857_v55  ;;  %808 = vst.msk [vmem:[#allocation2 + $0x48] sm:$0xff] %vm232_vm0, %v775_v50  ;;  %824 = vst.msk [vmem:[#allocation2 + $0xc8] sm:$0xff] %vm232_vm0, %v791_v51 }
 0x12a   : > { %v927_v57 = vmax.f32 %v895_v49, 0.0  ;;  %v912_v0 = vmax.f32 %v880_v58, 0.0  ;;  %v679_v3 = vpop.f32.mrb[20].mxu0  ;;  %v743_v4 = vpop.f32.mrb[20].mxu1 }
 0x12b   : > { %v1295_v62 = vpack.c.bf16 %v911_v56, %v911_v56  ;;  %v928_v1 = vmax.f32 %v896_v59, 0.0  ;;  %v776_v9 = vadd.f32 %v679_v3, %v275_v60  ;;  %v792_v10 = vadd.f32 %v743_v4, %v291_v61  ;;  %v681_v11 = vpop.f32.mrb[21].mxu0  ;;  %v745_v12 = vpop.f32.mrb[21].mxu1  ;;  %v279_v61 = vld [vmem:[#allocation2 + $0x70] sm:$0xff] }
 0x12c   : > { %v1311_v63 = vpack.c.bf16 %v927_v57, %v927_v57  ;;  %v1296_v7 = vpack.c.bf16 %v912_v0, %v912_v0  ;;  %v682_v15 = vpop.f32.mrb[22].mxu0  ;;  %v746_v16 = vpop.f32.mrb[22].mxu1 }
 0x12d   : > { %1072 = vst.msk [vmem:[%s1652_s22 + $0x18] sm:$0xf] %vm1065_vm4, %v1295_v62  ;;  %v1312_v8 = vpack.c.bf16 %v928_v1, %v928_v1  ;;  %v777_v19 = vadd.f32 %v682_v15, %v276_v5  ;;  %v793_v20 = vadd.f32 %v746_v16, %v292_v6  ;;  %v684_v21 = vpop.f32.mrb[23].mxu0  ;;  %v748_v22 = vpop.f32.mrb[23].mxu1  ;;  %v295_v62 = vld [vmem:[#allocation2 + $0xf0] sm:$0xff]  ;;  %v280_v6 = vld [vmem:[#allocation2 + $0x78] sm:$0xff] }
 0x12e   : > { %1088 = vst.msk [vmem:[%s1652_s22 + $0x58] sm:$0xf] %vm1065_vm4, %v1311_v63  ;;  %1073 = vst.msk [vmem:[%s1652_s22 + $0x1c] sm:$0xf] %vm1065_vm4, %v1296_v7  ;;  %v296_v7 = vld [vmem:[#allocation2 + $0xf8] sm:$0xff] }
 0x12f   : > { %v842_v13 = vld [vmem:[#allocation2 + $0x40] sm:$0xff]  ;;  %1089 = vst.msk [vmem:[%s1652_s22 + $0x5c] sm:$0xf] %vm1065_vm4, %v1312_v8 }
 0x130   : > { %v858_v14 = vld [vmem:[#allocation2 + $0xc0] sm:$0xff]  ;;  %v881_v17 = vadd.f32 %v1638_v2, %v842_v13  ;;  %809 = vst.msk [vmem:[#allocation2 + $0x50] sm:$0xff] %vm232_vm0, %v776_v9  ;;  %825 = vst.msk [vmem:[#allocation2 + $0xd0] sm:$0xff] %vm232_vm0, %v792_v10  ;;  %v843_v23 = vld [vmem:[#allocation2 + $0x48] sm:$0xff] }
 0x131   : > { %v897_v18 = vadd.f32 %v1638_v2, %v858_v14  ;;  %v859_v24 = vld [vmem:[#allocation2 + $0xc8] sm:$0xff]  ;;  %v882_v27 = vadd.f32 %v1638_v2, %v843_v23  ;;  %810 = vst.msk [vmem:[#allocation2 + $0x58] sm:$0xff] %vm232_vm0, %v777_v19  ;;  %826 = vst.msk [vmem:[#allocation2 + $0xd8] sm:$0xff] %vm232_vm0, %v793_v20 }
 0x132   : > { %v913_v25 = vmax.f32 %v881_v17, 0.0  ;;  %v898_v28 = vadd.f32 %v1638_v2, %v859_v24  ;;  %v687_v35 = vpop.f32.mrb[24].mxu0  ;;  %v751_v36 = vpop.f32.mrb[24].mxu1 }
 0x133   : > { %v929_v26 = vmax.f32 %v897_v18, 0.0  ;;  %v914_v33 = vmax.f32 %v882_v27, 0.0  ;;  %v778_v41 = vadd.f32 %v687_v35, %v277_v29  ;;  %v794_v42 = vadd.f32 %v751_v36, %v293_v30  ;;  %v689_v43 = vpop.f32.mrb[25].mxu0  ;;  %v753_v44 = vpop.f32.mrb[25].mxu1 }
 0x134   : > { %v1297_v31 = vpack.c.bf16 %v913_v25, %v913_v25  ;;  %v930_v34 = vmax.f32 %v898_v28, 0.0  ;;  %v690_v47 = vpop.f32.mrb[26].mxu0  ;;  %v754_v48 = vpop.f32.mrb[26].mxu1 }
 0x135   : > { %v1313_v32 = vpack.c.bf16 %v929_v26, %v929_v26  ;;  %v1298_v39 = vpack.c.bf16 %v914_v33, %v914_v33  ;;  %811 = vst.msk [vmem:[#allocation2 + $0x60] sm:$0xff] %vm232_vm0, %v778_v41  ;;  %827 = vst.msk [vmem:[#allocation2 + $0xe0] sm:$0xff] %vm232_vm0, %v794_v42  ;;  %v779_v51 = vadd.f32 %v690_v47, %v278_v37  ;;  %v692_v53 = vpop.f32.mrb[27].mxu0  ;;  %v756_v54 = vpop.f32.mrb[27].mxu1 }
 0x136   : > { %1074 = vst.msk [vmem:[%s1652_s22 + $0x20] sm:$0xf] %vm1065_vm4, %v1297_v31  ;;  %v1314_v40 = vpack.c.bf16 %v930_v34, %v930_v34  ;;  %v795_v52 = vadd.f32 %v754_v48, %v294_v38 }
 0x137   : > { %1090 = vst.msk [vmem:[%s1652_s22 + $0x60] sm:$0xf] %vm1065_vm4, %v1313_v32  ;;  %v844_v45 = vld [vmem:[#allocation2 + $0x50] sm:$0xff]  ;;  %1075 = vst.msk [vmem:[%s1652_s22 + $0x24] sm:$0xf] %vm1065_vm4, %v1298_v39 }
 0x138   : > { %v860_v46 = vld [vmem:[#allocation2 + $0xd0] sm:$0xff]  ;;  %1091 = vst.msk [vmem:[%s1652_s22 + $0x64] sm:$0xf] %vm1065_vm4, %v1314_v40  ;;  %v883_v49 = vadd.f32 %v1638_v2, %v844_v45  ;;  %v845_v55 = vld [vmem:[#allocation2 + $0x58] sm:$0xff] }
 0x139   : > { %v899_v50 = vadd.f32 %v1638_v2, %v860_v46  ;;  %v861_v56 = vld [vmem:[#allocation2 + $0xd8] sm:$0xff]  ;;  %v884_v59 = vadd.f32 %v1638_v2, %v845_v55  ;;  %812 = vst.msk [vmem:[#allocation2 + $0x68] sm:$0xff] %vm232_vm0, %v779_v51  ;;  %828 = vst.msk [vmem:[#allocation2 + $0xe8] sm:$0xff] %vm232_vm0, %v795_v52 }
 0x13a   : > { %v915_v57 = vmax.f32 %v883_v49, 0.0  ;;  %v900_v60 = vadd.f32 %v1638_v2, %v861_v56  ;;  %v695_v4 = vpop.f32.mrb[28].mxu0  ;;  %v759_v5 = vpop.f32.mrb[28].mxu1 }
 0x13b   : > { %v931_v58 = vmax.f32 %v899_v50, 0.0  ;;  %v916_v1 = vmax.f32 %v884_v59, 0.0  ;;  %v780_v10 = vadd.f32 %v695_v4, %v279_v61  ;;  %v796_v11 = vadd.f32 %v759_v5, %v295_v62  ;;  %v697_v12 = vpop.f32.mrb[29].mxu0  ;;  %v761_v13 = vpop.f32.mrb[29].mxu1 }
 0x13c   : > { %v1299_v63 = vpack.c.bf16 %v915_v57, %v915_v57  ;;  %v932_v3 = vmax.f32 %v900_v60, 0.0  ;;  %v846_v14 = vld [vmem:[#allocation2 + $0x60] sm:$0xff]  ;;  %v698_v16 = vpop.f32.mrb[30].mxu0  ;;  %v762_v17 = vpop.f32.mrb[30].mxu1 }
 0x13d   : > { %v1315_v0 = vpack.c.bf16 %v931_v58, %v931_v58  ;;  %v1300_v8 = vpack.c.bf16 %v916_v1, %v916_v1  ;;  %v862_v15 = vld [vmem:[#allocation2 + $0xe0] sm:$0xff]  ;;  %v885_v18 = vadd.f32 %v1638_v2, %v846_v14  ;;  %813 = vst.msk [vmem:[#allocation2 + $0x70] sm:$0xff] %vm232_vm0, %v780_v10  ;;  %829 = vst.msk [vmem:[#allocation2 + $0xf0] sm:$0xff] %vm232_vm0, %v796_v11  ;;  %v700_v22 = vpop.f32.mrb[31].mxu0  ;;  %v764_v23 = vpop.f32.mrb[31].mxu1 }
 0x13e   : > { %1076 = vst.msk [vmem:[%s1652_s22 + $0x28] sm:$0xf] %vm1065_vm4, %v1299_v63  ;;  %v1316_v9 = vpack.c.bf16 %v932_v3, %v932_v3  ;;  %v901_v19 = vadd.f32 %v1638_v2, %v862_v15  ;;  %v781_v20 = vadd.f32 %v698_v16, %v280_v6  ;;  %v797_v21 = vadd.f32 %v762_v17, %v296_v7 }
 0x13f   : > { %1092 = vst.msk [vmem:[%s1652_s22 + $0x68] sm:$0xf] %vm1065_vm4, %v1315_v0  ;;  %1077 = vst.msk [vmem:[%s1652_s22 + $0x2c] sm:$0xf] %vm1065_vm4, %v1300_v8  ;;  %v917_v26 = vmax.f32 %v885_v18, 0.0 }
 0x140   : > { %1093 = vst.msk [vmem:[%s1652_s22 + $0x6c] sm:$0xf] %vm1065_vm4, %v1316_v9  ;;  %v847_v24 = vld [vmem:[#allocation2 + $0x68] sm:$0xff]  ;;  %v933_v27 = vmax.f32 %v901_v19, 0.0 }
 0x141   : > { %v863_v25 = vld [vmem:[#allocation2 + $0xe8] sm:$0xff]  ;;  %v886_v28 = vadd.f32 %v1638_v2, %v847_v24  ;;  %814 = vst.msk [vmem:[#allocation2 + $0x78] sm:$0xff] %vm232_vm0, %v781_v20  ;;  %830 = vst.msk [vmem:[#allocation2 + $0xf8] sm:$0xff] %vm232_vm0, %v797_v21  ;;  %v1301_v30 = vpack.c.bf16 %v917_v26, %v917_v26 }
 0x142   : > { %v902_v29 = vadd.f32 %v1638_v2, %v863_v25  ;;  %v1317_v31 = vpack.c.bf16 %v933_v27, %v933_v27 }
 0x143   : > { %v918_v32 = vmax.f32 %v886_v28, 0.0  ;;  %1078 = vst.msk [vmem:[%s1652_s22 + $0x30] sm:$0xf] %vm1065_vm4, %v1301_v30 }
 0x144   : > { %v934_v33 = vmax.f32 %v902_v29, 0.0  ;;  %1094 = vst.msk [vmem:[%s1652_s22 + $0x70] sm:$0xf] %vm1065_vm4, %v1317_v31  ;;  %v848_v36 = vld [vmem:[#allocation2 + $0x70] sm:$0xff] }
 0x145   : > { %v1302_v34 = vpack.c.bf16 %v918_v32, %v918_v32  ;;  %v864_v37 = vld [vmem:[#allocation2 + $0xf0] sm:$0xff]  ;;  %v887_v38 = vadd.f32 %v1638_v2, %v848_v36 }
 0x146   : > { %v1318_v35 = vpack.c.bf16 %v934_v33, %v934_v33  ;;  %v903_v39 = vadd.f32 %v1638_v2, %v864_v37 }
 0x147   : > { %1079 = vst.msk [vmem:[%s1652_s22 + $0x34] sm:$0xf] %vm1065_vm4, %v1302_v34  ;;  %v919_v42 = vmax.f32 %v887_v38, 0.0 }
 0x148   : > { %1095 = vst.msk [vmem:[%s1652_s22 + $0x74] sm:$0xf] %vm1065_vm4, %v1318_v35  ;;  %v849_v40 = vld [vmem:[#allocation2 + $0x78] sm:$0xff]  ;;  %v935_v43 = vmax.f32 %v903_v39, 0.0 }
 0x149   : > { %v865_v41 = vld [vmem:[#allocation2 + $0xf8] sm:$0xff]  ;;  %v888_v44 = vadd.f32 %v1638_v2, %v849_v40  ;;  %v1303_v46 = vpack.c.bf16 %v919_v42, %v919_v42 }
 0x14a   : > { %v904_v45 = vadd.f32 %v1638_v2, %v865_v41  ;;  %v1319_v47 = vpack.c.bf16 %v935_v43, %v935_v43 }
 0x14b   : > { %v920_v48 = vmax.f32 %v888_v44, 0.0  ;;  %1080 = vst.msk [vmem:[%s1652_s22 + $0x38] sm:$0xf] %vm1065_vm4, %v1303_v46 }
 0x14c   : > { %v936_v49 = vmax.f32 %v904_v45, 0.0  ;;  %1096 = vst.msk [vmem:[%s1652_s22 + $0x78] sm:$0xf] %vm1065_vm4, %v1319_v47 }
 0x14d   : > { %v1304_v50 = vpack.c.bf16 %v920_v48, %v920_v48 }
 0x14e   : > { %v1320_v51 = vpack.c.bf16 %v936_v49, %v936_v49 }
 0x14f   : > { %1081 = vst.msk [vmem:[%s1652_s22 + $0x3c] sm:$0xf] %vm1065_vm4, %v1304_v50 }
 0x150   : > { %1097 = vst.msk [vmem:[%s1652_s22 + $0x7c] sm:$0xf] %vm1065_vm4, %v1320_v51 }
 0x151 PF: > { %s13_s14 = sadd.s32 1, %s1448_s14   ;;  %s1783_s12 = smov %s1444_s13 }
 0x152   : > { %p10_p5 = scmp.ge.s32.totalorder %s13_s14, 10   ;;  %s1784_s13 = smov %s1786_s15 }
 0x154   :  { %12 = sbr.rel (!%p10_p5) target bundleno = 2 (0x2), region = 73 }

</bundles_post_ra>
